<compile_context>
chip_gen: v7x
topology: tpu7x:2x2x1
jax: 0.10.0
libtpu: 0.0.40
codegen_flags: <defaults>
</compile_context>

<pallas_src>
import math

import jax
import jax.numpy as jnp
from jax.experimental import pallas as pl
from jax.experimental.pallas import tpu as pltpu


def _vmem_capacity_bytes():
    """Physical VMEM per TensorCore; conservative fallback (v7x = 64 MiB)."""
    try:
        return int(pltpu.get_tpu_info().vmem_capacity_bytes)
    except Exception:
        return 64 * 1024 * 1024


def _transition_conv_kernel(x_ref, scale_ref, shift_ref, w_ref, o_ref):
    """BN-affine -> ReLU -> avg-pool -> 1x1 conv (one MXU matmul).

    x_ref:     (TH, k, Wp, k*Cin)  k = pool size
    scale_ref: (1, k*Cin)          BN scale, tiled k times along channels
    shift_ref: (1, k*Cin)          BN shift, tiled k times along channels
    w_ref:     (k*Cin, Cout)       conv weight tiled k times along K, * 1/k^2
    o_ref:     (TH, Wp, Cout)
    """
    x = x_ref[...].astype(jnp.float32)               # keep VPU math in f32
    s = scale_ref[...].astype(jnp.float32)[0]        # (k*Cin,)
    b = shift_ref[...].astype(jnp.float32)[0]

    y = jnp.maximum(x * s + b, 0.0)                  # BN + ReLU (VPU FMA + max)

    k = x_ref.shape[1]
    yh = y[:, 0]
    for a in range(1, k):                            # H-pool: k major-axis adds
        yh = yh + y[:, a]                            # (TH, Wp, k*Cin)

    # W-pool + 1/k^2 + 1x1 conv folded into one MXU matmul, fed in the MXU
    # dtype (bf16 by default) with an f32 accumulate.
    th, wp, kcin = yh.shape
    w = w_ref[...]                                   # (k*Cin, Cout)
    lhs = yh.reshape(th * wp, kcin).astype(w.dtype)
    out = jnp.dot(lhs, w, preferred_element_type=jnp.float32)
    o_ref[...] = out.reshape(th, wp, w.shape[1]).astype(o_ref.dtype)


def _transition_pool_kernel(x_ref, scale_ref, shift_ref, o_ref):
    """BN-affine -> ReLU -> kxk avg-pool, pure VPU (last=True branch).

    x_ref:     (TH, k, Wp, k*Cin)
    scale_ref: (1, k*Cin)
    shift_ref: (1, k*Cin)
    o_ref:     (TH, Wp, Cin)
    """
    x = x_ref[...].astype(jnp.float32)
    s = scale_ref[...].astype(jnp.float32)[0]
    b = shift_ref[...].astype(jnp.float32)[0]

    y = jnp.maximum(x * s + b, 0.0)

    k = x_ref.shape[1]
    yh = y[:, 0]
    for a in range(1, k):                            # H-pool: k major-axis adds
        yh = yh + y[:, a]                            # (TH, Wp, k*Cin)

    cin = o_ref.shape[-1]
    acc = yh[:, :, 0:cin]
    for bb in range(1, k):                           # W-pool: k static lane slices
        acc = acc + yh[:, :, bb * cin:(bb + 1) * cin]
    o_ref[...] = (acc * (1.0 / (k * k))).astype(o_ref.dtype)


def transition_forward(x, gamma, beta, running_mean, running_var,
                       conv_weight=None, *, last=False, eps=1e-5,
                       block_rows=None, mxu_dtype=jnp.bfloat16,
                       interpret=False):
    """Forward pass of the DenseNet Transition layer (NCHW in, NCHW out)."""
    N, Cin, H, W = x.shape
    k = 8 if last else 2

    # PyTorch avg_pool2d (stride=k, no padding) drops trailing rows/cols.
    Hc, Wc = (H // k) * k, (W // k) * k
    Hp, Wp = Hc // k, Wc // k
    if (Hc, Wc) != (H, W):
        x = x[:, :, :Hc, :Wc]

    # Fold eval-mode BatchNorm into per-channel scale/shift.
    scale = (gamma / jnp.sqrt(running_var + eps)).astype(jnp.float32)
    shift = (beta - running_mean * scale).astype(jnp.float32)

    kcin = k * Cin
    scale_t = jnp.tile(scale, (k,)).reshape(1, kcin)
    shift_t = jnp.tile(shift, (k,)).reshape(1, kcin)

    # NCHW -> NHWC, then a layout-free reshape grouping the pooling window:
    #   (N, H, W, C) -> (N*Hp, k, Wp, k*C)   (last dim interleaves (w-offset, c))
    x_nhwc = jnp.transpose(x, (0, 2, 3, 1))
    xr = x_nhwc.reshape(N * Hp, k, Wp, kcin)

    M = N * Hp
    itemsize = xr.dtype.itemsize

    if last:
        Cout = Cin
        w_tiled = None
        kernel = _transition_pool_kernel
        const_bytes = 2 * kcin * 4                          # scale + shift
        operands = (xr, scale_t, shift_t)
    else:
        Cout = conv_weight.shape[0]
        w2d = conv_weight.reshape(Cout, Cin).T.astype(jnp.float32)   # (Cin, Cout)
        # Tile k times along K (folds the W-pool) and pre-scale by 1/k^2.
        w_tiled = (jnp.tile(w2d, (k, 1)) * (1.0 / (k * k))).astype(mxu_dtype)
        kernel = _transition_conv_kernel
        const_bytes = 2 * kcin * 4 + w_tiled.size * w_tiled.dtype.itemsize
        operands = (xr, scale_t, shift_t, w_tiled)

    in_row = k * Wp * kcin * itemsize        # bytes per grid-row of input
    out_row = Wp * Cout * itemsize           # bytes per grid-row of output

    cap = _vmem_capacity_bytes()
    if block_rows is None:
        # Spend ~half of physical VMEM on the (double-buffered) pipeline
        # working set; constants are double-buffered too.
        budget = max(8 << 20, int(cap * 0.5)) - 2 * const_bytes
        per_row = 2 * (in_row + out_row)
        block_rows = max(1, min(M, budget // max(per_row, 1)))
        # Keep a single input block <= ~8 MiB (sweet spot per HBM roofline data).
        block_rows = min(block_rows, max(1, (8 << 20) // max(in_row, 1)))
        if block_rows >= 8:
            block_rows = (block_rows // 8) * 8
        # Prefer TH*Wp to be a multiple of 128 (lane-dense MXU M dimension).
        if block_rows * Wp >= 128:
            step = 128 // math.gcd(128, Wp)
            aligned = (block_rows // step) * step
            if aligned >= 1:
                block_rows = aligned
    TH = int(min(max(block_rows, 1), M))

    # v7x megacore: make sure the "parallel" grid axis has >= 2 steps.
    if pl.cdiv(M, TH) == 1 and M > 8:
        TH = max(8, (((M + 1) // 2 + 7) // 8) * 8)
        if TH >= M:
            TH = max(1, M // 2)
    grid = (pl.cdiv(M, TH),)

    work_bytes = 2 * TH * (in_row + out_row) + 2 * const_bytes
    vmem_limit = int(min(cap - (8 << 20), max(work_bytes + (8 << 20), 32 << 20)))

    if last:
        flops = 4 * M * k * Wp * kcin                       # FMA + ReLU + pool adds
        bytes_accessed = xr.size * itemsize + M * Wp * Cout * itemsize + 2 * kcin * 4
    else:
        flops = 2 * M * Wp * kcin * Cout + 3 * M * k * Wp * kcin
        bytes_accessed = (xr.size * itemsize + M * Wp * Cout * itemsize
                          + w_tiled.size * w_tiled.dtype.itemsize + 2 * kcin * 4)
    cost = pl.CostEstimate(flops=int(flops), transcendentals=0,
                           bytes_accessed=int(bytes_accessed))

    in_specs = [
        pl.BlockSpec((TH, k, Wp, kcin), lambda t: (t, 0, 0, 0)),
        pl.BlockSpec((1, kcin), lambda t: (0, 0)),
        pl.BlockSpec((1, kcin), lambda t: (0, 0)),
    ]
    if not last:
        in_specs.append(pl.BlockSpec((kcin, Cout), lambda t: (0, 0)))

    out = pl.pallas_call(
        kernel,
        out_shape=jax.ShapeDtypeStruct((M, Wp, Cout), x.dtype),
        grid_spec=pltpu.PrefetchScalarGridSpec(
            num_scalar_prefetch=0,
            grid=grid,
            in_specs=in_specs,
            out_specs=pl.BlockSpec((TH, Wp, Cout), lambda t: (t, 0, 0)),
        ),
        compiler_params=pltpu.CompilerParams(
            dimension_semantics=("parallel",),
            vmem_limit_bytes=vmem_limit,
        ),
        cost_estimate=cost,
        interpret=interpret,
    )(*operands)

    out = out.reshape(N, Hp, Wp, Cout)
    return jnp.transpose(out, (0, 3, 1, 2))                 # back to NCHW


def _reference(x, gamma, beta, mean, var, conv_weight, last, eps=1e-5):
    """Pure-JAX reference matching the PyTorch module (eval-mode BN)."""
    inv = 1.0 / jnp.sqrt(var + eps)
    xn = (x - mean[None, :, None, None]) * inv[None, :, None, None]
    y = jnp.maximum(xn * gamma[None, :, None, None] + beta[None, :, None, None], 0.0)
    if not last:
        w2d = conv_weight.reshape(conv_weight.shape[0], conv_weight.shape[1])
        y = jnp.einsum("nchw,oc->nohw", y, w2d)
        k = 2
    else:
        k = 8
    n, c, h, w = y.shape
    y = y[:, :, : (h // k) * k, : (w // k) * k]
    y = y.reshape(n, c, h // k, k, w // k, k).mean(axis=(3, 5))
    return y


if __name__ == "__main__":
    key = jax.random.PRNGKey(0)
    k1, k2, k3, k4, k5, k6 = jax.random.split(key, 6)

    N, Cin, H, W = 2, 16, 16, 16
    Cout = 8

    x = jax.random.normal(k1, (N, Cin, H, W), jnp.float32)
    gamma = 1.0 + 0.1 * jax.random.normal(k2, (Cin,), jnp.float32)
    beta = 0.1 * jax.random.normal(k3, (Cin,), jnp.float32)
    running_mean = 0.1 * jax.random.normal(k4, (Cin,), jnp.float32)
    running_var = jax.random.uniform(k5, (Cin,), jnp.float32, minval=0.5, maxval=1.5)
    conv_w = 0.1 * jax.random.normal(k6, (Cout, Cin, 1, 1), jnp.float32)

    # not-last branch: BN -> ReLU -> 1x1 conv -> avg_pool(2)
    out_a = transition_forward(x, gamma, beta, running_mean, running_var,
                               conv_w, last=False)
    out_a = jax.block_until_ready(out_a)
    ref_a = _reference(x, gamma, beta, running_mean, running_var, conv_w, last=False)
    assert out_a.shape == (N, Cout, H // 2, W // 2), out_a.shape
    assert jnp.allclose(out_a, ref_a, atol=2e-2, rtol=2e-2), (
        float(jnp.max(jnp.abs(out_a - ref_a))))

    # last branch: BN -> ReLU -> avg_pool(8)  (pool-only kernel, no MXU)
    out_b = transition_forward(x, gamma, beta, running_mean, running_var,
                               None, last=True)
    out_b = jax.block_until_ready(out_b)
    ref_b = _reference(x, gamma, beta, running_mean, running_var, None, last=True)
    assert out_b.shape == (N, Cin, H // 8, W // 8), out_b.shape
    assert jnp.allclose(out_b, ref_b, atol=2e-2, rtol=2e-2), (
        float(jnp.max(jnp.abs(out_b - ref_b))))

    print("KERNEL_OK")
</pallas_src>

<mosaic_0001>
module attributes {stable_mosaic.version = 11 : i64} {
  func.func @_transition_conv_kernel(%arg0: i32, %arg1: memref<8x2x8x32xf32, #tpu.memory_space<vmem>>, %arg2: memref<1x32xf32, #tpu.memory_space<vmem>>, %arg3: memref<1x32xf32, #tpu.memory_space<vmem>>, %arg4: memref<32x8xbf16, #tpu.memory_space<vmem>>, %arg5: memref<8x8x8xf32, #tpu.memory_space<vmem>>) attributes {dimension_semantics = [#tpu.dimension_semantics<parallel>], iteration_bounds = array<i64: 2>, scalar_prefetch = 0 : i64, scratch_operands = 0 : i64, tpu.core_type = #tpu.core_type<tc>, window_params = [{transform_indices = @transform_0, window_bounds = array<i64: 8, 2, 8, 32>}, {pipeline_mode = #tpu.pipeline_mode<synchronous>, transform_indices = @transform_1, window_bounds = array<i64: 1, 32>}, {pipeline_mode = #tpu.pipeline_mode<synchronous>, transform_indices = @transform_2, window_bounds = array<i64: 1, 32>}, {pipeline_mode = #tpu.pipeline_mode<synchronous>, transform_indices = @transform_3, window_bounds = array<i64: 32, 8>}, {transform_indices = @transform_4, window_bounds = array<i64: 8, 8, 8>}]} {
    %c0 = arith.constant 0 : index
    %c0_0 = arith.constant 0 : index
    %c0_1 = arith.constant 0 : index
    %c0_2 = arith.constant 0 : index
    %0 = vector.load %arg1[%c0, %c0_0, %c0_1, %c0_2] : memref<8x2x8x32xf32, #tpu.memory_space<vmem>>, vector<8x2x8x32xf32>
    %c0_3 = arith.constant 0 : index
    %c0_4 = arith.constant 0 : index
    %1 = vector.load %arg2[%c0_3, %c0_4] : memref<1x32xf32, #tpu.memory_space<vmem>>, vector<1x32xf32>
    %2 = vector.shape_cast %1 : vector<1x32xf32> to vector<32xf32>
    %c0_5 = arith.constant 0 : index
    %c0_6 = arith.constant 0 : index
    %3 = vector.load %arg3[%c0_5, %c0_6] : memref<1x32xf32, #tpu.memory_space<vmem>>, vector<1x32xf32>
    %4 = vector.shape_cast %3 : vector<1x32xf32> to vector<32xf32>
    %5 = vector.shape_cast %2 : vector<32xf32> to vector<1x1x1x32xf32>
    %6 = vector.broadcast %5 : vector<1x1x1x32xf32> to vector<8x2x8x32xf32>
    %7 = arith.mulf %0, %6 : vector<8x2x8x32xf32>
    %8 = vector.shape_cast %4 : vector<32xf32> to vector<1x1x1x32xf32>
    %9 = vector.broadcast %8 : vector<1x1x1x32xf32> to vector<8x2x8x32xf32>
    %10 = arith.addf %7, %9 : vector<8x2x8x32xf32>
    %cst = arith.constant 0.000000e+00 : f32
    %11 = vector.broadcast %cst : f32 to vector<8x2x8x32xf32>
    %12 = arith.maximumf %10, %11 : vector<8x2x8x32xf32>
    %13 = vector.extract_strided_slice %12 {offsets = [0, 0, 0, 0], sizes = [8, 1, 8, 32], strides = [1, 1, 1, 1]} : vector<8x2x8x32xf32> to vector<8x1x8x32xf32>
    %14 = vector.shape_cast %13 : vector<8x1x8x32xf32> to vector<8x8x32xf32>
    %15 = vector.extract_strided_slice %12 {offsets = [0, 1, 0, 0], sizes = [8, 1, 8, 32], strides = [1, 1, 1, 1]} : vector<8x2x8x32xf32> to vector<8x1x8x32xf32>
    %16 = vector.shape_cast %15 : vector<8x1x8x32xf32> to vector<8x8x32xf32>
    %17 = arith.addf %14, %16 : vector<8x8x32xf32>
    %c0_7 = arith.constant 0 : index
    %c0_8 = arith.constant 0 : index
    %18 = vector.load %arg4[%c0_7, %c0_8] : memref<32x8xbf16, #tpu.memory_space<vmem>>, vector<32x8xbf16>
    %19 = vector.shape_cast %17 : vector<8x8x32xf32> to vector<64x32xf32>
    %20 = arith.truncf %19 : vector<64x32xf32> to vector<64x32xbf16>
    %cst_9 = arith.constant dense<0.000000e+00> : vector<64x8xf32>
    %21 = tpu.matmul %20, %18, %cst_9 {dimension_numbers = #tpu.dot_dimension_numbers<[1], [0], [0], [1], [0, 0, 1, 1], [], []>} : vector<64x32xbf16>, vector<32x8xbf16>, vector<64x8xf32> -> vector<64x8xf32>
    %22 = vector.shape_cast %21 : vector<64x8xf32> to vector<8x8x8xf32>
    %c0_10 = arith.constant 0 : index
    %c0_11 = arith.constant 0 : index
    %c0_12 = arith.constant 0 : index
    %23 = vector.load %arg5[%c0_10, %c0_11, %c0_12] : memref<8x8x8xf32, #tpu.memory_space<vmem>>, vector<8x8x8xf32>
    tpu.vector_store %arg5[%c0_10, %c0_11, %c0_12], %22 {strides = array<i32>} : memref<8x8x8xf32, #tpu.memory_space<vmem>>, vector<8x8x8xf32>,
    return
  }
  func.func @transform_0(%arg0: i32) -> (i32, i32, i32, i32) {
    %c0_i32 = arith.constant 0 : i32
    %c0_i32_0 = arith.constant 0 : i32
    %c0_i32_1 = arith.constant 0 : i32
    %c0_i32_2 = arith.constant 0 : i32
    return %arg0, %c0_i32, %c0_i32_0, %c0_i32_1 : i32, i32, i32, i32
  }
  func.func @transform_1(%arg0: i32) -> (i32, i32) {
    %c0_i32 = arith.constant 0 : i32
    %c0_i32_0 = arith.constant 0 : i32
    %c0_i32_1 = arith.constant 0 : i32
    return %c0_i32, %c0_i32_0 : i32, i32
  }
  func.func @transform_2(%arg0: i32) -> (i32, i32) {
    %c0_i32 = arith.constant 0 : i32
    %c0_i32_0 = arith.constant 0 : i32
    %c0_i32_1 = arith.constant 0 : i32
    return %c0_i32, %c0_i32_0 : i32, i32
  }
  func.func @transform_3(%arg0: i32) -> (i32, i32) {
    %c0_i32 = arith.constant 0 : i32
    %c0_i32_0 = arith.constant 0 : i32
    %c0_i32_1 = arith.constant 0 : i32
    return %c0_i32, %c0_i32_0 : i32, i32
  }
  func.func @transform_4(%arg0: i32) -> (i32, i32, i32) {
    %c0_i32 = arith.constant 0 : i32
    %c0_i32_0 = arith.constant 0 : i32
    %c0_i32_1 = arith.constant 0 : i32
    return %arg0, %c0_i32, %c0_i32_0 : i32, i32, i32
  }
}

</mosaic_0001>

<bundles_post_ra>
// kernel: tpu_custom_call.1
= control target key start
LH: loop header
LB: loop body
LE: loop exit
PB: predicated region body
PF: predicated region fallthrough
CT: control target
= control target key end

     0   :  { %9 = vsyncpa [#allocation3], 0  ;;  %s850_s0 = inlined_call_operand.hbm [shape: f32[16,2,8,32], index: 0, kind: input, shape index: {}]   ;;  %s851_s1 = inlined_call_operand.vmem [shape: f32[1,32], index: 1, kind: input, shape index: {}]   ;;  %s852_s2 = inlined_call_operand.vmem [shape: f32[1,32], index: 2, kind: input, shape index: {}]   ;;  %s853_s3 = inlined_call_operand.vmem [shape: bf16[32,8], index: 3, kind: input, shape index: {}]   ;;  %s854_s4 = inlined_call_operand.vmem [shape: f32[16,8,8], index: 4, kind: output, shape index: {}]  }
   0x1   :  { %11 = vsyncpa [#allocation3 + $0x1], 0  ;;  %s665_s15 = smov 0   ;;  %s667_s16 = smov 0  }
   0x2   :  { %s669_s17 = smov 0   ;;  %s671_s18 = smov 0  }
   0x3 LB: > { %s482_s19 = sadd.s32 4294967295, %s635_s18   ;;  %s685_s20 = sadd.s32 1, %s635_s18   ;;  %s635_s18 = sphi %s671_s18, %s861_s18   ;;  %s631_s17 = sphi %s669_s17, %s860_s17   ;;  %s627_s16 = sphi %s667_s16, %s859_s16   ;;  %s623_s15 = sphi %s665_s15, %s858_s15  }
   0x4   : > { %s21_s21 = ssub.s32 %s635_s18, %s685_s20  ;;  %s24_s22 = sadd.s32 1, %s631_s17 }
   0x5   : > { %p22_p0 = scmp.eq.s32.totalorder %s21_s21, 0  ;;  %p31_p1 = scmp.ne.s32.totalorder %s631_s17, %s627_s16 }
   0x6   : > { %p32_p2 = scmp.eq.s32.totalorder %s635_s18, 0  ;;  %p37_p3 = scmp.ne.s32.totalorder %s627_s16, %s623_s15 }
   0x7   : > { %s695_s23 = scalar_select %p22_p0, %s631_s17, %s24_s22  }
   0x8   : > { %p33_p4 = por %p32_p2, %p31_p1  ;;  %p38_p5 = scmp.eq.s32.totalorder %s482_s19, 0 }
   0x9   : > { %p534_p6 = scmp.lt.s32.totalorder %s635_s18, 2  ;;  %s159_s25 = sand.u32 1, %s631_s17  }
   0xa   : > { %p700_p7 = por %p38_p5, %p37_p3  ;;  %s486_s26 = sshll.u32 %s159_s25, 7 }
   0xb   : > { %s505_s27 = sshll.u32 %s635_s18, 11  ;;  %s163_s5 = scalar_lea.vmem [#allocation2], %s486_s26 }
   0xc   : > { %s709_s30 = scalar_lea.hbm %s850_s0, %s505_s27  ;;  %s171_s6 = sshll.u32 %s163_s5, 4  ;;  %s711_s6 = int_to_ptr.vmem [resolvable:$true] %s171_s6 }
   0xd   : > { %p713_p8 = pnand %p534_p6, %p33_p4  ;;  %s718_s8 = scalar_lea.sflag [#allocation3], %s159_s25 }
   0xe   : > { %s571_s9 = scalar_lea.hbm %s709_s30, 2048  ;;  %s576_s12 = scalar_lea.hbm %s850_s0, 4096 }
   0xf   : > { %p572_p10 = scmp.ne.s32.totalorder %s709_s30, %s571_s9  ;;  %p573_p11 = pneg %p713_p8 }
  0x10   : > { %p577_p0 = scmp.lt.u32.totalorder %s709_s30, %s850_s0  ;;  %p578_p1 = scmp.lt.u32.totalorder %s576_s12, %s571_s9 }
  0x11   : > { %p574_p12 = pnand %p573_p11, %p572_p10  ;;  %p580_p3 = scmp.lt.u32.totalorder %s571_s9, %s709_s30 }
  0x12   : > { %p579_p2 = por %p578_p1, %p577_p0 }
  0x13   : > { %p575_p13 = pneg %p574_p12 }
  0x14   : > { %p581_p4 = por %p580_p3, %p579_p2 }
  0x16   : > { %p582_p5 = pnand %p581_p4, %p575_p13 }
  0x18   : > { %585 = shalt.err (!%p582_p5)
}
  0x19   : > { %s586_s15 = scalar_lea.vmem %s711_s6, 2048  ;;  %s637_s21 = smov [#allocation2]  }
  0x1a   : > { %p587_p6 = scmp.ne.s32.totalorder %s711_s6, %s586_s15  ;;  %s591_s22 = sshll.u32 %s637_s21, 4  ;;  %s592_s22 = int_to_ptr.vmem [resolvable:$false] %s591_s22 }
  0x1b   : > { %s593_s25 = scalar_lea.vmem %s592_s22, 4096  ;;  %p594_p9 = scmp.lt.s32.totalorder %s711_s6, %s592_s22 }
  0x1c   : > { %p589_p10 = pnand %p587_p6, %p573_p11  ;;  %p595_p0 = scmp.lt.s32.totalorder %s593_s25, %s586_s15 }
  0x1e   : > { %p590_p12 = pneg %p589_p10  ;;  %p596_p1 = por %p595_p0, %p594_p9 }
  0x20   : > { %p597_p2 = pnand %p596_p1, %p590_p12 }
  0x22   : > { %600 = shalt.err (!%p597_p2)
}
  0x23   : > { %s638_s26 = smov 128   ;;  %s639_s27 = smov 8  }
  0x24   : > { %533 = dma.hbm_to_vmem [thread:$0]  (!%p713_p8), %s709_s30, 2048, %s711_s6, %s718_s8, %s638_s26, %s638_s26, %s639_s27  }
  0x25   : > { %p179_p11 = scmp.lt.s32.totalorder %s635_s18, 3  ;;  %p857_p13 = scmp.ge.s32.totalorder %s635_s18, 1 }
  0x27   : > { %p180_p3 = pnand %p857_p13, %p179_p11 }
  0x28   : > { %s185_s28 = sand.u32 (!%p180_p3), 1, %s627_s16  }
  0x29   : > { %183 = sbr.rel (%p180_p3) target bundleno = 289 (0x121), region = 36  ;;  %s491_s29 = sshll.u32 (!%p180_p3), %s185_s28, 7 }
  0x2a   : > { %s186_s5 = scalar_lea.sflag (!%p180_p3), [#allocation3], %s185_s28  ;;  %s750_s9 = scalar_lea.vmem (!%p180_p3), [#allocation2], %s491_s29 }
  0x30   : > { %618 = dma.done.wait (%p700_p7), %s186_s5, 2048  }
  0x31   : > { %620 = vsyncadd (%p700_p7), %s186_s5, 4294965248  ;;  %v569_v0 = vld [vmem:[%s853_s3] sm:$0xff]   ;;  %v570_v1 = vld [vmem:[%s853_s3 + $0x8] sm:$0xff]   ;;  %vm328_vm0 = vcmask 261120   ;;  %s492_s13 = sshll.u32 %s482_s19, 3  ;;  %vm406_vm1 = vcmask 64512  }
  0x32   : > { %512 = vmatprep.subr.bf16.mxu0 %v569_v0  ;;  %524 = vmatprep.subr.bf16.mxu1 %v569_v0  ;;  %v222_v2 = vld [vmem:[%s750_s9] sm:$0xff]  ;;  %v223_v3 = vld [vmem:[%s750_s9 + $0x8] sm:$0xff]  ;;  %v224_v4 = vld [vmem:[%s750_s9 + $0x10] sm:$0xff]  ;;  %p216_p7 = scmp.lt.s32.totalorder %s492_s13, 15 }
  0x33   : > { %513 = vmatpush3.bf16.msra.mxu0 %v569_v0  ;;  %526 = vmatpush3.bf16.msra.mxu1 %v569_v0  ;;  %v225_v5 = vld [vmem:[%s750_s9 + $0x18] sm:$0xff]  ;;  %v769_v6 = vld [vmem:[%s851_s1] ss:$0 sm:$0xff]  ;;  %v231_v12 = vld [vmem:[%s750_s9 + $0x48] sm:$0xff] }
  0x34   : > { %v774_v7 = vld [vmem:[%s852_s2] ss:$0 sm:$0xff]  ;;  %514 = vmatprep.subr.bf16.mxu0 %v570_v1  ;;  %525 = vmatprep.subr.bf16.mxu1 %v570_v1  ;;  %v246_v8 = vmul.f32 %v769_v6, %v222_v2  ;;  %v247_v9 = vmul.f32 %v769_v6, %v223_v3  ;;  %v248_v10 = vmul.f32 %v769_v6, %v224_v4  ;;  %v232_v13 = vld [vmem:[%s750_s9 + $0x50] sm:$0xff]  ;;  %v233_v15 = vld [vmem:[%s750_s9 + $0x58] sm:$0xff]  ;;  %s863_s13 = smov (!%p216_p7, %s492_s13), 15 }
  0x35   : > { %v230_v11 = vld [vmem:[%s750_s9 + $0x40] sm:$0xff]  ;;  %v249_v14 = vmul.f32 %v769_v6, %v225_v5  ;;  %v255_v17 = vmul.f32 %v769_v6, %v231_v12  ;;  %v256_v18 = vmul.f32 %v769_v6, %v232_v13  ;;  %v257_v22 = vmul.f32 %v769_v6, %v233_v15  ;;  %v227_v27 = vld [vmem:[%s750_s9 + $0x28] sm:$0xff]  ;;  %v228_v32 = vld [vmem:[%s750_s9 + $0x30] sm:$0xff]  ;;  %s493_s14 = sshll.u32 %s863_s13, 3 }
  0x36   : > { %v254_v16 = vmul.f32 %v769_v6, %v230_v11  ;;  %v268_v19 = vadd.f32 %v774_v7, %v246_v8  ;;  %v269_v20 = vadd.f32 %v774_v7, %v247_v9  ;;  %v270_v21 = vadd.f32 %v774_v7, %v248_v10  ;;  %v226_v26 = vld [vmem:[%s750_s9 + $0x20] sm:$0xff]  ;;  %v229_v37 = vld [vmem:[%s750_s9 + $0x38] sm:$0xff]  ;;  %v235_v43 = vld [vmem:[%s750_s9 + $0x68] sm:$0xff]  ;;  %s219_s22 = scalar_lea.vmem %s854_s4, %s493_s14 }
  0x37   : > { %515 = vmatpush3.bf16.msra.mxu0 %v570_v1  ;;  %527 = vmatpush3.bf16.msra.mxu1 %v570_v1  ;;  %v271_v23 = vadd.f32 %v774_v7, %v249_v14  ;;  %v277_v25 = vadd.f32 %v774_v7, %v255_v17  ;;  %v278_v31 = vadd.f32 %v774_v7, %v256_v18  ;;  %v234_v38 = vld [vmem:[%s750_s9 + $0x60] sm:$0xff]  ;;  %v236_v48 = vld [vmem:[%s750_s9 + $0x70] sm:$0xff]  ;;  %v237_v52 = vld [vmem:[%s750_s9 + $0x78] sm:$0xff] }
  0x38   : > { %v276_v24 = vadd.f32 %v774_v7, %v254_v16  ;;  %v284_v28 = vmax.f32 %v268_v19, 0.0  ;;  %v285_v29 = vmax.f32 %v269_v20, 0.0  ;;  %v286_v30 = vmax.f32 %v270_v21, 0.0 }
  0x39   : > { %v287_v33 = vmax.f32 %v271_v23, 0.0  ;;  %v279_v34 = vadd.f32 %v774_v7, %v257_v22  ;;  %v293_v36 = vmax.f32 %v277_v25, 0.0  ;;  %v294_v40 = vmax.f32 %v278_v31, 0.0 }
  0x3a   : > { %v292_v35 = vmax.f32 %v276_v24, 0.0  ;;  %v300_v39 = vadd.f32 %v285_v29, %v284_v28  ;;  %v250_v41 = vmul.f32 %v769_v6, %v226_v26  ;;  %v251_v42 = vmul.f32 %v769_v6, %v227_v27 }
  0x3b   : > { %v301_v44 = vadd.f32 %v287_v33, %v286_v30  ;;  %v295_v45 = vmax.f32 %v279_v34, 0.0  ;;  %v252_v47 = vmul.f32 %v769_v6, %v228_v32  ;;  %v253_v49 = vmul.f32 %v769_v6, %v229_v37 }
  0x3c   : > { %v304_v46 = vadd.f32 %v293_v36, %v292_v35  ;;  %v272_v50 = vadd.f32 %v774_v7, %v250_v41  ;;  %v273_v51 = vadd.f32 %v774_v7, %v251_v42  ;;  %v258_v53 = vmul.f32 %v769_v6, %v234_v38 }
  0x3d   : > { %v312_v54 = vpack.c.bf16 %v301_v44, %v300_v39  ;;  %v305_v55 = vadd.f32 %v295_v45, %v294_v40  ;;  %v274_v56 = vadd.f32 %v774_v7, %v252_v47  ;;  %v259_v57 = vmul.f32 %v769_v6, %v235_v43 }
  0x3e   : > { %v275_v58 = vadd.f32 %v774_v7, %v253_v49  ;;  %v288_v59 = vmax.f32 %v272_v50, 0.0  ;;  %v289_v60 = vmax.f32 %v273_v51, 0.0  ;;  %v260_v61 = vmul.f32 %v769_v6, %v236_v48 }
  0x3f   : > { %516 = vmatprep.mubr.msk.bf16.mxu0 %vm328_vm0, %v312_v54  ;;  %v314_v62 = vpack.c.bf16 %v305_v55, %v304_v46  ;;  %v290_v63 = vmax.f32 %v274_v56, 0.0  ;;  %v261_v0 = vmul.f32 %v769_v6, %v237_v52  ;;  %v280_v1 = vadd.f32 %v774_v7, %v258_v53 }
  0x40   : > { %v291_v2 = vmax.f32 %v275_v58, 0.0  ;;  %v302_v3 = vadd.f32 %v289_v60, %v288_v59  ;;  %v281_v4 = vadd.f32 %v774_v7, %v259_v57  ;;  %v282_v5 = vadd.f32 %v774_v7, %v260_v61 }
  0x41   : > { %520 = vmatprep.mubr.msk.bf16.mxu1 %vm328_vm0, %v314_v62  ;;  %v283_v8 = vadd.f32 %v774_v7, %v261_v0  ;;  %v296_v9 = vmax.f32 %v280_v1, 0.0 }
  0x42   : > { %v303_v10 = vadd.f32 %v291_v2, %v290_v63  ;;  %v297_v11 = vmax.f32 %v281_v4, 0.0  ;;  %v298_v12 = vmax.f32 %v282_v5, 0.0 }
  0x43   : > { %v299_v13 = vmax.f32 %v283_v8, 0.0 }
  0x44   : > { %v313_v14 = vpack.c.bf16 %v303_v10, %v302_v3  ;;  %v306_v6 = vadd.f32 %v297_v11, %v296_v9 }
  0x45   : > { %v307_v15 = vadd.f32 %v299_v13, %v298_v12 }
  0x46   : > { %517 = vmatmul.mubr.msk.bf16.vlgmr.msra.gmra.mrb[0].mxu0 %vm328_vm0, %v313_v14 }
  0x47   : > { %v315_v16 = vpack.c.bf16 %v307_v15, %v306_v6 }
  0x49   : > { %521 = vmatmul.mubr.msk.bf16.vlgmr.msra.gmra.mrb[0].mxu1 %vm328_vm0, %v315_v16 }
 0x119   : > { %v518_v7 = vpop.f32.mrb[0].mxu0 }
 0x11a   : > { %409 = vst.msk [vmem:[%s219_s22 + $0x10] sm:$0xff] %vm406_vm1, %v518_v7  ;;  %v375_v17 = vpop.f32.mrb[1].mxu0 }
 0x11b   : > { %407 = vst.msk [vmem:[%s219_s22] sm:$0xff] %vm406_vm1, %v375_v17  ;;  %v519_v18 = vpop.f32.mrb[2].mxu0 }
 0x11c   : > { %v522_v19 = vpop.f32.mrb[0].mxu1  ;;  %410 = vst.msk [vmem:[%s219_s22 + $0x18] sm:$0xff] %vm406_vm1, %v519_v18  ;;  %v378_v20 = vpop.f32.mrb[3].mxu0 }
 0x11d   : > { %413 = vst.msk [vmem:[%s219_s22 + $0x30] sm:$0xff] %vm406_vm1, %v522_v19  ;;  %v391_v21 = vpop.f32.mrb[1].mxu1  ;;  %408 = vst.msk [vmem:[%s219_s22 + $0x8] sm:$0xff] %vm406_vm1, %v378_v20 }
 0x11e   : > { %411 = vst.msk [vmem:[%s219_s22 + $0x20] sm:$0xff] %vm406_vm1, %v391_v21  ;;  %v523_v22 = vpop.f32.mrb[2].mxu1 }
 0x11f   : > { %414 = vst.msk [vmem:[%s219_s22 + $0x38] sm:$0xff] %vm406_vm1, %v523_v22  ;;  %v394_v23 = vpop.f32.mrb[3].mxu1 }
 0x120   : > { %412 = vst.msk [vmem:[%s219_s22 + $0x28] sm:$0xff] %vm406_vm1, %v394_v23 }
 0x121 PF: > { %p14_p8 = scmp.ge.s32.totalorder %s685_s20, 4   ;;  %s858_s15 = smov %s627_s16 }
 0x122   : > { %s859_s16 = smov %s631_s17  ;;  %s860_s17 = smov %s695_s23 }
 0x123   : > { %s861_s18 = smov %s685_s20  ;;  %16 = sbr.rel (!%p14_p8) target bundleno = 3 (0x3), region = 76 }
 0x12a   :  { %437 = vsyncpa [#allocation3], 1 }
 0x12b   :  { %439 = vsyncpa [#allocation3 + $0x1], 1 }

</bundles_post_ra>
